<compile_context>
chip_gen: v5e
topology: v5e:2x2
jax: 0.10.0
libtpu: 0.0.40
codegen_flags: <defaults>
</compile_context>

<pallas_src>
import functools

import jax
import jax.numpy as jnp
from jax.experimental import pallas as pl
from jax.experimental.pallas import tpu as pltpu


PALM_IDXS = (0, 1, 5, 9, 13, 17)
THUMB_IDXS = (2, 3, 4)
INDEX_IDXS = (6, 7, 8)
MIDDLE_IDXS = (10, 11, 12)
RING_IDXS = (14, 15, 16)
PINKY_IDXS = (18, 19, 20)

_MAX_TILE_N = 4096  # rows per block; ~8 MiB double-buffered padded VMEM (f32)


def _pool21_kernel(x_ref, o_ref):
    """x_ref: (TILE_N, 21) -> o_ref: (TILE_N, 6) grouped keypoint max."""
    x = x_ref[...]
    # Palm: indices (0, 1, 5, 9, 13, 17) -> contiguous pair + four singles.
    palm = jnp.max(x[:, 0:2], axis=1, keepdims=True)
    palm = jnp.maximum(palm, x[:, 5:6])
    palm = jnp.maximum(palm, x[:, 9:10])
    palm = jnp.maximum(palm, x[:, 13:14])
    palm = jnp.maximum(palm, x[:, 17:18])
    # Fingers: contiguous runs of 3 keypoints each.
    thumb = jnp.max(x[:, 2:5], axis=1, keepdims=True)
    index = jnp.max(x[:, 6:9], axis=1, keepdims=True)
    middle = jnp.max(x[:, 10:13], axis=1, keepdims=True)
    ring = jnp.max(x[:, 14:17], axis=1, keepdims=True)
    pinky = jnp.max(x[:, 18:21], axis=1, keepdims=True)
    o_ref[...] = jnp.concatenate(
        [palm, thumb, index, middle, ring, pinky], axis=1
    )


def _pool_last_kernel(x_ref, o_ref):
    """x_ref: (TILE_N, 6) -> o_ref: (TILE_N, 1) plain max over keypoints."""
    o_ref[...] = jnp.max(x_ref[...], axis=1, keepdims=True)


def _pick_tile_n(n):
    """Row-tile size: big tiles for fewer grid steps, >= 2 steps when possible."""
    if n <= 1024:
        return n  # single block (block dim == full array dim is always legal)
    half = -(-n // 2)  # ceil(n / 2): keep at least 2 steps for v7x dual-TC
    return min(_MAX_TILE_N, ((half + 7) // 8) * 8)


@functools.partial(jax.jit, static_argnames=("last",))
def mediapipe_hand_pooling(x, last=False):
    """JAX/Pallas equivalent of MediapipeHandPooling.forward.

    x: (B, C, T, K) with K == 21 (last=False) or K == 6 (last=True).
    Returns (B, C, T, 6) or (B, C, T, 1) respectively.
    """
    B, C, T, K = x.shape
    if last:
        assert K == 6, f"expected 6 keypoints when last=True, got {K}"
        kernel, G = _pool_last_kernel, 1
    else:
        assert K == 21, f"expected 21 keypoints when last=False, got {K}"
        kernel, G = _pool21_kernel, 6

    N = B * C * T
    xf = x.reshape(N, K)  # free view: keypoint axis stays minor/contiguous
    tile_n = _pick_tile_n(N)
    grid = (pl.cdiv(N, tile_n),)  # partial last block handled by Pallas

    out = pl.pallas_call(
        kernel,
        out_shape=jax.ShapeDtypeStruct((N, G), x.dtype),
        grid=grid,
        in_specs=[pl.BlockSpec((tile_n, K), lambda i: (i, 0))],
        out_specs=pl.BlockSpec((tile_n, G), lambda i: (i, 0)),
        compiler_params=pltpu.CompilerParams(
            dimension_semantics=("parallel",)
        ),
    )(xf)

    return out.reshape(B, C, T, G)


def _reference(x, last=False):
    """Pure-JAX reference mirroring the PyTorch forward exactly."""
    if last:
        return jnp.max(x, axis=3, keepdims=True)
    groups = (PALM_IDXS, THUMB_IDXS, INDEX_IDXS, MIDDLE_IDXS, RING_IDXS,
              PINKY_IDXS)
    return jnp.concatenate(
        [jnp.max(x[..., list(g)], axis=3, keepdims=True) for g in groups],
        axis=3,
    )


if __name__ == "__main__":
    key = jax.random.PRNGKey(0)
    k1, k2, k3 = jax.random.split(key, 3)

    # Stage 1 (last=False): 21 keypoints -> 6 hand parts.
    B, C, T = 2, 4, 16
    x_full = jax.random.normal(k1, (B, C, T, 21), dtype=jnp.float32)
    y_full = jax.block_until_ready(mediapipe_hand_pooling(x_full, last=False))
    assert y_full.shape == (B, C, T, 6)
    assert jnp.allclose(y_full, _reference(x_full, last=False)), "full mismatch"

    # Stage 2 (last=True): 6 hand parts -> 1.
    x_last = jax.random.normal(k2, (B, C, T, 6), dtype=jnp.float32)
    y_last = jax.block_until_ready(mediapipe_hand_pooling(x_last, last=True))
    assert y_last.shape == (B, C, T, 1)
    assert jnp.allclose(y_last, _reference(x_last, last=True)), "last mismatch"

    # Partial-last-block case: N = 2*5*130 = 1300 rows -> 2 grid steps with a
    # non-divisible tail (exercises Pallas' masked partial block).
    x_odd = jax.random.normal(k3, (2, 5, 130, 21), dtype=jnp.float32)
    y_odd = jax.block_until_ready(mediapipe_hand_pooling(x_odd, last=False))
    assert jnp.allclose(y_odd, _reference(x_odd, last=False)), "partial mismatch"

    # bf16 stays bf16 end-to-end (max is exact in bf16).
    x_bf = x_full.astype(jnp.bfloat16)
    y_bf = jax.block_until_ready(mediapipe_hand_pooling(x_bf, last=False))
    assert y_bf.dtype == jnp.bfloat16
    assert jnp.array_equal(y_bf, _reference(x_bf, last=False)), "bf16 mismatch"

    print("KERNEL_OK")
</pallas_src>

<mosaic_0001>
module attributes {stable_mosaic.version = 11 : i64} {
  func.func @_pool21_kernel(%arg0: i32, %arg1: memref<128x21xf32, #tpu.memory_space<vmem>>, %arg2: memref<128x6xf32, #tpu.memory_space<vmem>>) attributes {dimension_semantics = [#tpu.dimension_semantics<parallel>], iteration_bounds = array<i64: 1>, scalar_prefetch = 0 : i64, scratch_operands = 0 : i64, tpu.core_type = #tpu.core_type<tc>, window_params = [{transform_indices = @transform_0, window_bounds = array<i64: 128, 21>}, {transform_indices = @transform_1, window_bounds = array<i64: 128, 6>}]} {
    %c0 = arith.constant 0 : index
    %c0_0 = arith.constant 0 : index
    %0 = vector.load %arg1[%c0, %c0_0] : memref<128x21xf32, #tpu.memory_space<vmem>>, vector<128x21xf32>
    %1 = vector.extract_strided_slice %0 {offsets = [0, 0], sizes = [128, 2], strides = [1, 1]} : vector<128x21xf32> to vector<128x2xf32>
    %cst = arith.constant dense<0xFF800000> : vector<128xf32>
    %2 = vector.multi_reduction <maximumf>, %1, %cst [1] : vector<128x2xf32> to vector<128xf32>
    %3 = vector.shape_cast %2 : vector<128xf32> to vector<128x1xf32>
    %4 = vector.extract_strided_slice %0 {offsets = [0, 5], sizes = [128, 1], strides = [1, 1]} : vector<128x21xf32> to vector<128x1xf32>
    %5 = arith.maximumf %3, %4 : vector<128x1xf32>
    %6 = vector.extract_strided_slice %0 {offsets = [0, 9], sizes = [128, 1], strides = [1, 1]} : vector<128x21xf32> to vector<128x1xf32>
    %7 = arith.maximumf %5, %6 : vector<128x1xf32>
    %8 = vector.extract_strided_slice %0 {offsets = [0, 13], sizes = [128, 1], strides = [1, 1]} : vector<128x21xf32> to vector<128x1xf32>
    %9 = arith.maximumf %7, %8 : vector<128x1xf32>
    %10 = vector.extract_strided_slice %0 {offsets = [0, 17], sizes = [128, 1], strides = [1, 1]} : vector<128x21xf32> to vector<128x1xf32>
    %11 = arith.maximumf %9, %10 : vector<128x1xf32>
    %12 = vector.extract_strided_slice %0 {offsets = [0, 2], sizes = [128, 3], strides = [1, 1]} : vector<128x21xf32> to vector<128x3xf32>
    %cst_1 = arith.constant dense<0xFF800000> : vector<128xf32>
    %13 = vector.multi_reduction <maximumf>, %12, %cst_1 [1] : vector<128x3xf32> to vector<128xf32>
    %14 = vector.shape_cast %13 : vector<128xf32> to vector<128x1xf32>
    %15 = vector.extract_strided_slice %0 {offsets = [0, 6], sizes = [128, 3], strides = [1, 1]} : vector<128x21xf32> to vector<128x3xf32>
    %cst_2 = arith.constant dense<0xFF800000> : vector<128xf32>
    %16 = vector.multi_reduction <maximumf>, %15, %cst_2 [1] : vector<128x3xf32> to vector<128xf32>
    %17 = vector.shape_cast %16 : vector<128xf32> to vector<128x1xf32>
    %18 = vector.extract_strided_slice %0 {offsets = [0, 10], sizes = [128, 3], strides = [1, 1]} : vector<128x21xf32> to vector<128x3xf32>
    %cst_3 = arith.constant dense<0xFF800000> : vector<128xf32>
    %19 = vector.multi_reduction <maximumf>, %18, %cst_3 [1] : vector<128x3xf32> to vector<128xf32>
    %20 = vector.shape_cast %19 : vector<128xf32> to vector<128x1xf32>
    %21 = vector.extract_strided_slice %0 {offsets = [0, 14], sizes = [128, 3], strides = [1, 1]} : vector<128x21xf32> to vector<128x3xf32>
    %cst_4 = arith.constant dense<0xFF800000> : vector<128xf32>
    %22 = vector.multi_reduction <maximumf>, %21, %cst_4 [1] : vector<128x3xf32> to vector<128xf32>
    %23 = vector.shape_cast %22 : vector<128xf32> to vector<128x1xf32>
    %24 = vector.extract_strided_slice %0 {offsets = [0, 18], sizes = [128, 3], strides = [1, 1]} : vector<128x21xf32> to vector<128x3xf32>
    %cst_5 = arith.constant dense<0xFF800000> : vector<128xf32>
    %25 = vector.multi_reduction <maximumf>, %24, %cst_5 [1] : vector<128x3xf32> to vector<128xf32>
    %26 = vector.shape_cast %25 : vector<128xf32> to vector<128x1xf32>
    %27 = tpu.concatenate %11, %14, %17, %20, %23, %26 in 1 : vector<128x1xf32>, vector<128x1xf32>, vector<128x1xf32>, vector<128x1xf32>, vector<128x1xf32>, vector<128x1xf32> -> vector<128x6xf32>
    %c0_6 = arith.constant 0 : index
    %c0_7 = arith.constant 0 : index
    %28 = vector.load %arg2[%c0_6, %c0_7] : memref<128x6xf32, #tpu.memory_space<vmem>>, vector<128x6xf32>
    tpu.vector_store %arg2[%c0_6, %c0_7], %27 {strides = array<i32>} : memref<128x6xf32, #tpu.memory_space<vmem>>, vector<128x6xf32>,
    return
  }
  func.func @transform_0(%arg0: i32) -> (i32, i32) {
    %c0_i32 = arith.constant 0 : i32
    %c0_i32_0 = arith.constant 0 : i32
    return %arg0, %c0_i32 : i32, i32
  }
  func.func @transform_1(%arg0: i32) -> (i32, i32) {
    %c0_i32 = arith.constant 0 : i32
    %c0_i32_0 = arith.constant 0 : i32
    return %arg0, %c0_i32 : i32, i32
  }
}

</mosaic_0001>

<bundles_post_ra>
// kernel: mediapipe_hand_pooling.1
= control target key start
LH: loop header
LB: loop body
LE: loop exit
PB: predicated region body
PF: predicated region fallthrough
CT: control target
= control target key end

     0   :  { %6 = vsyncpa [#allocation3], 0  ;;  %s761_s9 = smov [#allocation2]   ;;  %s762_s11 = smov 128   ;;  %s1643_s0 = inlined_call_operand.hbm [shape: f32[128,21], index: 0, kind: input, shape index: {}]   ;;  %s1644_s1 = inlined_call_operand.vmem [shape: f32[128,6], index: 1, kind: output, shape index: {}]  }
   0x1   :  { %s11_s8 = sshll.u32 %s1643_s0, 4  ;;  %s13_s10 = sshll.u32 %s761_s9, 4  ;;  %s12_s8 = int_to_ptr.hbm [resolvable:$true] %s11_s8  ;;  %s14_s10 = int_to_ptr.vmem [resolvable:$true] %s13_s10 }
   0x2   :  { %s763_s12 = smov 8  }
   0x3   :  { %19 = dma.hbm_to_vmem [thread:$0]  %s12_s8, 2048, %s14_s10, [#allocation3], %s762_s11, %s762_s11, %s763_s12  }
   0x4   :  { %759 = dma.done.wait [#allocation3], 2048  }
   0x5   :  { %760 = vsyncadd [#allocation3], 4294965248  ;;  %vm40_vm0 = vcmask 15360   ;;  %v781_v0 = vld [vmem:[#allocation2 + $0x20] sm:$0xff]  ;;  %v783_v1 = vld [vmem:[#allocation2 + $0x10] sm:$0xff]  ;;  %s764_s0 = smov 124  }
   0x6   :  { %v785_v2 = vld [vmem:[#allocation2] sm:$0xff]  ;;  %v53_v3 = vsel %vm40_vm0, %v781_v0, -inf  ;;  %v47_v4 = vsel %vm40_vm0, %v783_v1, -inf  ;;  %v793_v6 = vld [vmem:[#allocation2 + $0x28] sm:$0xff]  ;;  %v795_v7 = vld [vmem:[#allocation2 + $0x18] sm:$0xff]  ;;  %s765_s13 = smov 120  }
   0x7   :  { %v41_v5 = vsel %vm40_vm0, %v785_v2, -inf  ;;  %54 = vmax.xlane.f32.xlu2 %v53_v3  ;;  %48 = vmax.xlane.f32.xlu1 %v47_v4  ;;  %v797_v8 = vld [vmem:[#allocation2 + $0x8] sm:$0xff]  ;;  %v56_v9 = vsel %vm40_vm0, %v793_v6, -inf  ;;  %v50_v10 = vsel %vm40_vm0, %v795_v7, -inf  ;;  %v805_v12 = vld [vmem:[#allocation2 + $0x40] sm:$0xff]  ;;  %v807_v13 = vld [vmem:[#allocation2 + $0x38] sm:$0xff] }
   0x8   :  { %42 = vmax.xlane.f32.xlu0 %v41_v5  ;;  %v44_v11 = vsel %vm40_vm0, %v797_v8, -inf  ;;  %v809_v14 = vld [vmem:[#allocation2 + $0x30] sm:$0xff]  ;;  %v65_v15 = vsel %vm40_vm0, %v805_v12, -inf  ;;  %v62_v16 = vsel %vm40_vm0, %v807_v13, -inf  ;;  %v817_v18 = vld [vmem:[#allocation2 + $0x58] sm:$0xff]  ;;  %v821_v20 = vld [vmem:[#allocation2 + $0x48] sm:$0xff] }
   0x9   :  { %v59_v17 = vsel %vm40_vm0, %v809_v14, -inf  ;;  %v819_v19 = vld [vmem:[#allocation2 + $0x50] sm:$0xff]  ;;  %v74_v21 = vsel %vm40_vm0, %v817_v18, -inf  ;;  %v68_v23 = vsel %vm40_vm0, %v821_v20, -inf  ;;  %v831_v25 = vld [vmem:[#allocation2 + $0x68] sm:$0xff]  ;;  %v833_v26 = vld [vmem:[#allocation2 + $0x60] sm:$0xff] }
   0xa   :  { %v71_v22 = vsel %vm40_vm0, %v819_v19, -inf  ;;  %v829_v24 = vld [vmem:[#allocation2 + $0x70] sm:$0xff]  ;;  %v80_v28 = vsel %vm40_vm0, %v831_v25, -inf  ;;  %v77_v29 = vsel %vm40_vm0, %v833_v26, -inf  ;;  %v841_v30 = vld [vmem:[#allocation2 + $0x78] sm:$0xff]  ;;  %s766_s14 = smov 116  }
   0xb   :  { %v83_v27 = vsel %vm40_vm0, %v829_v24, -inf  ;;  %v86_v31 = vsel %vm40_vm0, %v841_v30, -inf  ;;  %vm313_vm1 = vcmask 39952   ;;  %vm362_vm2 = vcmask 72752   ;;  %s767_s15 = smov 123  }
   0xc   :  { %vm411_vm3 = vcmask 105552   ;;  %vm460_vm4 = vcmask 138352   ;;  %vm509_vm5 = vcmask 171152   ;;  %vm622_vm6 = vcmask 7168  }
   0xd   :  { %vm655_vm7 = vcmask 23552   ;;  %vm672_vm8 = vcmask 31744   ;;  %vm689_vm9 = vcmask 39936   ;;  %vm706_vm10 = vcmask 48128  }
   0xf   :  { %57 = vmax.xlane.f32.xlu2 %v56_v9  ;;  %51 = vmax.xlane.f32.xlu1 %v50_v10 }
  0x10   :  { %45 = vmax.xlane.f32.xlu0 %v44_v11 }
  0x17   :  { %66 = vmax.xlane.f32.xlu2 %v65_v15  ;;  %63 = vmax.xlane.f32.xlu1 %v62_v16 }
  0x18   :  { %60 = vmax.xlane.f32.xlu0 %v59_v17 }
  0x1f   :  { %75 = vmax.xlane.f32.xlu2 %v74_v21  ;;  %72 = vmax.xlane.f32.xlu1 %v71_v22 }
  0x20   :  { %69 = vmax.xlane.f32.xlu0 %v68_v23 }
  0x27   :  { %84 = vmax.xlane.f32.xlu2 %v83_v27  ;;  %81 = vmax.xlane.f32.xlu1 %v80_v28 }
  0x28   :  { %78 = vmax.xlane.f32.xlu0 %v77_v29 }
  0x30   :  { %87 = vmax.xlane.f32.xlu0 %v86_v31 }
  0x3f   :  { %123 = vrot.lane.b32.xlu2 %v797_v8, %s764_s0 }
  0x40   :  { %121 = vrot.lane.b32.xlu1 %v785_v2, %s764_s0 }
  0x44   :  { %125 = vrot.lane.b32.xlu0 %v783_v1, %s764_s0 }
  0x47   :  { %127 = vrot.lane.b32.xlu2 %v795_v7, %s764_s0 }
  0x48   :  { %129 = vrot.lane.b32.xlu1 %v781_v0, %s764_s0 }
  0x4c   :  { %131 = vrot.lane.b32.xlu0 %v793_v6, %s764_s0 }
  0x4f   :  { %133 = vrot.lane.b32.xlu2 %v809_v14, %s764_s0 }
  0x50   :  { %135 = vrot.lane.b32.xlu1 %v807_v13, %s764_s0 }
  0x54   :  { %137 = vrot.lane.b32.xlu0 %v805_v12, %s764_s0 }
  0x57   :  { %139 = vrot.lane.b32.xlu2 %v821_v20, %s764_s0 }
  0x58   :  { %141 = vrot.lane.b32.xlu1 %v819_v19, %s764_s0 }
  0x5c   :  { %143 = vrot.lane.b32.xlu0 %v817_v18, %s764_s0 }
  0x5f   :  { %145 = vrot.lane.b32.xlu2 %v833_v26, %s764_s0 }
  0x60   :  { %147 = vrot.lane.b32.xlu1 %v831_v25, %s764_s0 }
  0x64   :  { %149 = vrot.lane.b32.xlu0 %v829_v24, %s764_s0 }
  0x67   :  { %151 = vrot.lane.b32.xlu2 %v841_v30, %s764_s0 }
  0x68   :  { %185 = vrot.lane.b32.xlu1 %v785_v2, %s765_s13 }
  0x6c   :  { %187 = vrot.lane.b32.xlu0 %v797_v8, %s765_s13 }
  0x6f   :  { %189 = vrot.lane.b32.xlu2 %v783_v1, %s765_s13 }
  0x70   :  { %191 = vrot.lane.b32.xlu1 %v795_v7, %s765_s13 }
  0x74   :  { %193 = vrot.lane.b32.xlu0 %v781_v0, %s765_s13 }
  0x77   :  { %195 = vrot.lane.b32.xlu2 %v793_v6, %s765_s13 }
  0x78   :  { %197 = vrot.lane.b32.xlu1 %v809_v14, %s765_s13 }
  0x7a   :  { %v868_v32 = vpop.xlane.xlu2 %54  ;;  %v49_v34 = vpop.xlane.xlu1 %48 }
  0x7b   :  { %v871_v33 = vpop.xlane.xlu0 %42  ;;  %v91_v3 = vmax.f32 %v49_v34, %v783_v1 }
  0x7c   :  { %199 = vrot.lane.b32.xlu0 %v807_v13, %s765_s13  ;;  %v89_v21 = vmax.f32 %v871_v33, %v785_v2 }
  0x7f   :  { %201 = vrot.lane.b32.xlu2 %v805_v12, %s765_s13 }
  0x80   :  { %203 = vrot.lane.b32.xlu1 %v821_v20, %s765_s13 }
  0x82   :  { %v875_v35 = vpop.xlane.xlu2 %57  ;;  %v884_v38 = vpop.xlane.xlu1 %51 }
  0x83   :  { %v878_v36 = vpop.xlane.xlu0 %45  ;;  %v94_v22 = vmax.f32 %v875_v35, %v793_v6 }
  0x84   :  { %205 = vrot.lane.b32.xlu0 %v819_v19, %s765_s13  ;;  %v90_v34 = vmax.f32 %v878_v36, %v797_v8 }
  0x87   :  { %207 = vrot.lane.b32.xlu2 %v817_v18, %s765_s13 }
  0x88   :  { %209 = vrot.lane.b32.xlu1 %v833_v26, %s765_s13 }
  0x8a   :  { %v882_v37 = vpop.xlane.xlu2 %66  ;;  %v894_v41 = vpop.xlane.xlu1 %63 }
  0x8b   :  { %v888_v39 = vpop.xlane.xlu0 %60 }
  0x8c   :  { %211 = vrot.lane.b32.xlu0 %v831_v25, %s765_s13 }
  0x8f   :  { %213 = vrot.lane.b32.xlu2 %v829_v24, %s765_s13 }
  0x90   :  { %215 = vrot.lane.b32.xlu1 %v841_v30, %s765_s13 }
  0x92   :  { %v891_v40 = vpop.xlane.xlu2 %75  ;;  %v902_v44 = vpop.xlane.xlu1 %72 }
  0x93   :  { %v898_v42 = vpop.xlane.xlu0 %69 }
  0x94   :  { %249 = vrot.lane.b32.xlu0 %v785_v2, %s766_s14 }
  0x97   :  { %251 = vrot.lane.b32.xlu2 %v797_v8, %s766_s14 }
  0x98   :  { %253 = vrot.lane.b32.xlu1 %v783_v1, %s766_s14 }
  0x9a   :  { %v85_v43 = vpop.xlane.xlu2 %84  ;;  %v82_v47 = vpop.xlane.xlu1 %81 }
  0x9b   :  { %v905_v46 = vpop.xlane.xlu0 %78  ;;  %v102_v4 = vmax.f32 %v82_v47, %v831_v25  ;;  %v103_v16 = vmax.f32 %v85_v43, %v829_v24  ;;  %v314_v47 = vsel %vm313_vm1, %v785_v2, -inf }
  0x9c   :  { %255 = vrot.lane.b32.xlu0 %v795_v7, %s766_s14 }
  0x9f   :  { %257 = vrot.lane.b32.xlu2 %v781_v0, %s766_s14 }
  0xa0   :  { %259 = vrot.lane.b32.xlu1 %v793_v6, %s766_s14 }
  0xa2   :  { %v124_v45 = vpop.permute.xlu2 %123 }
  0xa3   :  { %v88_v49 = vpop.xlane.xlu0 %87  ;;  %v959_v43 = vmax.f32 %v90_v34, %v124_v45 }
  0xa4   :  { %261 = vrot.lane.b32.xlu0 %v809_v14, %s766_s14  ;;  %v104_v59 = vmax.f32 %v88_v49, %v841_v30 }
  0xa7   :  { %263 = vrot.lane.b32.xlu2 %v807_v13, %s766_s14 }
  0xa8   :  { %265 = vrot.lane.b32.xlu1 %v805_v12, %s766_s14 }
  0xaa   :  { %v128_v48 = vpop.permute.xlu2 %127 }
  0xac   :  { %267 = vrot.lane.b32.xlu0 %v821_v20, %s766_s14 }
  0xaf   :  { %269 = vrot.lane.b32.xlu2 %v819_v19, %s766_s14 }
  0xb0   :  { %271 = vrot.lane.b32.xlu1 %v817_v18, %s766_s14 }
  0xb2   :  { %v913_v50 = vpop.permute.xlu2 %133  ;;  %v122_v51 = vpop.permute.xlu1 %121 }
  0xb3   :  { %v945_v27 = vmax.f32 %v89_v21, %v122_v51  ;;  %v92_v51 = vmax.f32 %v884_v38, %v795_v7  ;;  %v93_v38 = vmax.f32 %v868_v32, %v781_v0  ;;  %v100_v32 = vmax.f32 %v891_v40, %v817_v18 }
  0xb4   :  { %273 = vrot.lane.b32.xlu0 %v833_v26, %s766_s14 }
  0xb6   :  { %v126_v52 = vpop.permute.xlu0 %125 }
  0xb7   :  { %275 = vrot.lane.b32.xlu2 %v831_v25, %s766_s14  ;;  %v930_v5 = vmax.f32 %v91_v3, %v126_v52  ;;  %v97_v52 = vmax.f32 %v882_v37, %v805_v12 }
  0xb8   :  { %277 = vrot.lane.b32.xlu1 %v829_v24, %s766_s14 }
  0xba   :  { %v918_v53 = vpop.permute.xlu2 %139  ;;  %v130_v54 = vpop.permute.xlu1 %129 }
  0xbc   :  { %279 = vrot.lane.b32.xlu0 %v841_v30, %s766_s14 }
  0xbe   :  { %v132_v55 = vpop.permute.xlu0 %131 }
  0xbf   :  { %v947_v28 = vmax.f32 %v94_v22, %v132_v55  ;;  %v317_v55 = vsel %vm313_vm1, %v797_v8, -inf  ;;  %v326_v22 = vsel %vm313_vm1, %v781_v0, -inf }
  0xc2   :  { %v921_v56 = vpop.permute.xlu2 %145  ;;  %v136_v57 = vpop.permute.xlu1 %135 }
  0xc6   :  { %v138_v58 = vpop.permute.xlu0 %137 }
  0xc7   :  { %v972_v45 = vmax.f32 %v97_v52, %v138_v58  ;;  %v323_v58 = vsel %vm313_vm1, %v795_v7, -inf }
  0xca   :  { %v152_v60 = vpop.permute.xlu2 %151  ;;  %v924_v61 = vpop.permute.xlu1 %141 }
  0xcb   :  { %v926_v62 = vmax.f32 %v104_v59, %v152_v60  ;;  %v970_v59 = vmax.f32 %v92_v51, %v128_v48  ;;  %v320_v48 = vsel %vm313_vm1, %v783_v1, -inf }
  0xce   :  { %v144_v63 = vpop.permute.xlu0 %143 }
  0xd2   :  { %v932_v9 = vpop.permute.xlu2 %189  ;;  %v148_v10 = vpop.permute.xlu1 %147 }
  0xd3   :  { %v235_v11 = vmax.f32 %v930_v5, %v932_v9  ;;  %v936_v15 = vmax.f32 %v102_v4, %v148_v10  ;;  %v173_v10 = vmax.f32 %v93_v38, %v130_v54  ;;  %v997_v54 = vmax.f32 %v100_v32, %v144_v63 }
  0xd4   :  { %v332_v63 = vsel %vm313_vm1, %v809_v14, -inf  ;;  %v341_v32 = vsel %vm313_vm1, %v821_v20, -inf }
  0xd6   :  { %v150_v17 = vpop.permute.xlu0 %149 }
  0xd7   :  { %v943_v23 = vmax.f32 %v103_v16, %v150_v17  ;;  %v95_v17 = vmax.f32 %v888_v39, %v809_v14  ;;  %v96_v39 = vmax.f32 %v894_v41, %v807_v13  ;;  %v335_v41 = vsel %vm313_vm1, %v807_v13, -inf }
  0xd9   :  { %v995_v34 = vmax.f32 %v95_v17, %v913_v50  ;;  %v329_v50 = vsel %vm313_vm1, %v793_v6, -inf  ;;  %v176_v51 = vmax.f32 %v96_v39, %v136_v57  ;;  %v338_v17 = vsel %vm313_vm1, %v805_v12, -inf }
  0xda   :  { %v949_v29 = vpop.permute.xlu2 %195  ;;  %v951_v31 = vpop.permute.xlu1 %185  ;;  %v101_v39 = vmax.f32 %v905_v46, %v833_v26  ;;  %v347_v46 = vsel %vm313_vm1, %v817_v18, -inf }
  0xdb   :  { %v238_v33 = vmax.f32 %v947_v28, %v949_v29  ;;  %v233_v35 = vmax.f32 %v945_v27, %v951_v31  ;;  %v369_v27 = vsel %vm362_vm2, %v783_v1, -inf }
  0xde   :  { %v188_v49 = vpop.permute.xlu0 %187 }
  0xdf   :  { %v234_v36 = vmax.f32 %v959_v43, %v188_v49 }
  0xe0   :  { %315 = vmax.xlane.f32.xlu2 %v314_v47 }
  0xe2   :  { %v974_v60 = vpop.permute.xlu2 %201  ;;  %318 = vmax.xlane.f32.xlu1 %v317_v55  ;;  %v976_v3 = vpop.permute.xlu1 %191  ;;  %v98_v55 = vmax.f32 %v898_v42, %v821_v20 }
  0xe3   :  { %v241_v37 = vmax.f32 %v972_v45, %v974_v60  ;;  %v236_v4 = vmax.f32 %v970_v59, %v976_v3  ;;  %v378_v59 = vsel %vm362_vm2, %v793_v6, -inf }
  0xe6   :  { %321 = vmax.xlane.f32.xlu0 %v320_v48  ;;  %v194_v16 = vpop.permute.xlu0 %193  ;;  %v1018_v48 = vmax.f32 %v98_v55, %v918_v53 }
  0xe7   :  { %v237_v21 = vmax.f32 %v173_v10, %v194_v16 }
  0xe8   :  { %324 = vmax.xlane.f32.xlu2 %v323_v58  ;;  %v99_v58 = vmax.f32 %v902_v44, %v819_v19 }
  0xea   :  { %v999_v43 = vpop.permute.xlu2 %207  ;;  %327 = vmax.xlane.f32.xlu1 %v326_v22  ;;  %v1001_v47 = vpop.permute.xlu1 %197  ;;  %v179_v53 = vmax.f32 %v99_v58, %v924_v61 }
  0xeb   :  { %v244_v40 = vmax.f32 %v997_v54, %v999_v43  ;;  %v239_v49 = vmax.f32 %v995_v34, %v1001_v47  ;;  %v387_v34 = vsel %vm362_vm2, %v805_v12, -inf }
  0xee   :  { %330 = vmax.xlane.f32.xlu0 %v329_v50  ;;  %v200_v52 = vpop.permute.xlu0 %199  ;;  %v344_v50 = vsel %vm313_vm1, %v819_v19, -inf }
  0xef   :  { %v240_v38 = vmax.f32 %v176_v51, %v200_v52  ;;  %v1040_v51 = vmax.f32 %v101_v39, %v921_v56  ;;  %v356_v39 = vsel %vm313_vm1, %v829_v24, -inf }
  0xf0   :  { %333 = vmax.xlane.f32.xlu2 %v332_v63 }
  0xf2   :  { %v1020_v10 = vpop.permute.xlu2 %213  ;;  %336 = vmax.xlane.f32.xlu1 %v335_v41  ;;  %v1022_v57 = vpop.permute.xlu1 %203  ;;  %v350_v41 = vsel %vm313_vm1, %v833_v26, -inf }
  0xf3   :  { %v247_v16 = vmax.f32 %v943_v23, %v1020_v10  ;;  %v242_v42 = vmax.f32 %v1018_v48, %v1022_v57  ;;  %v412_v23 = vsel %vm411_vm3, %v785_v2, -inf  ;;  %v415_v10 = vsel %vm411_vm3, %v797_v8, -inf }
  0xf6   :  { %339 = vmax.xlane.f32.xlu0 %v338_v17  ;;  %v206_v22 = vpop.permute.xlu0 %205  ;;  %v353_v17 = vsel %vm313_vm1, %v831_v25, -inf }
  0xf7   :  { %v243_v44 = vmax.f32 %v179_v53, %v206_v22 }
  0xf8   :  { %342 = vmax.xlane.f32.xlu2 %v341_v32 }
  0xfa   :  { %v252_v63 = vpop.permute.xlu2 %251  ;;  %345 = vmax.xlane.f32.xlu1 %v344_v50  ;;  %v1042_v52 = vpop.permute.xlu1 %209 }
  0xfb   :  { %v1044_v61 = vmax.f32 %v234_v36, %v252_v63  ;;  %v245_v55 = vmax.f32 %v1040_v51, %v1042_v52 }
  0xfe   :  { %348 = vmax.xlane.f32.xlu0 %v347_v46  ;;  %v212_v58 = vpop.permute.xlu0 %211 }
  0xff   :  { %v246_v56 = vmax.f32 %v936_v15, %v212_v58  ;;  %v359_v15 = vsel %vm313_vm1, %v841_v30, -inf }
 0x100   :  { %351 = vmax.xlane.f32.xlu2 %v350_v41 }
 0x102   :  { %v258_v53 = vpop.permute.xlu2 %257  ;;  %354 = vmax.xlane.f32.xlu1 %v353_v17  ;;  %v1055_v36 = vpop.permute.xlu1 %215  ;;  %v366_v17 = vsel %vm362_vm2, %v797_v8, -inf }
 0x103   :  { %v1057_v32 = vmax.f32 %v237_v21, %v258_v53  ;;  %v248_v22 = vmax.f32 %v926_v62, %v1055_v36  ;;  %v363_v21 = vsel %vm362_vm2, %v785_v2, -inf  ;;  %v375_v36 = vsel %vm362_vm2, %v781_v0, -inf }
 0x106   :  { %357 = vmax.xlane.f32.xlu0 %v356_v39  ;;  %v250_v50 = vpop.permute.xlu0 %249 }
 0x107   :  { %v1068_v63 = vmax.f32 %v233_v35, %v250_v50  ;;  %v396_v50 = vsel %vm362_vm2, %v817_v18, -inf }
 0x108   :  { %360 = vmax.xlane.f32.xlu2 %v359_v15  ;;  %v384_v15 = vsel %vm362_vm2, %v807_v13, -inf }
 0x10a   :  { %v264_v46 = vpop.permute.xlu2 %263  ;;  %v254_v62 = vpop.permute.xlu1 %253  ;;  %364 = vmax.xlane.f32.xlu1 %v363_v21  ;;  %v405_v21 = vsel %vm362_vm2, %v829_v24, -inf }
 0x10b   :  { %v1072_v41 = vmax.f32 %v240_v38, %v264_v46  ;;  %v1077_v58 = vmax.f32 %v235_v11, %v254_v62  ;;  %v372_v38 = vsel %vm362_vm2, %v795_v7, -inf  ;;  %v424_v46 = vsel %vm411_vm3, %v781_v0, -inf }
 0x10c   :  { %v427_v62 = vsel %vm411_vm3, %v793_v6, -inf }
 0x10e   :  { %367 = vmax.xlane.f32.xlu0 %v366_v17  ;;  %v256_v31 = vpop.permute.xlu0 %255  ;;  %v430_v17 = vsel %vm411_vm3, %v809_v14, -inf }
 0x10f   :  { %v1086_v35 = vmax.f32 %v236_v4, %v256_v31  ;;  %v436_v31 = vsel %vm411_vm3, %v805_v12, -inf }
 0x110   :  { %370 = vmax.xlane.f32.xlu2 %v369_v27  ;;  %v433_v27 = vsel %vm411_vm3, %v807_v13, -inf }
 0x112   :  { %v270_v5 = vpop.permute.xlu2 %269  ;;  %v260_v9 = vpop.permute.xlu1 %259  ;;  %373 = vmax.xlane.f32.xlu1 %v372_v38  ;;  %v439_v38 = vsel %vm411_vm3, %v821_v20, -inf }
 0x113   :  { %v1090_v11 = vmax.f32 %v243_v44, %v270_v5  ;;  %v1095_v53 = vmax.f32 %v238_v33, %v260_v9  ;;  %v381_v44 = vsel %vm362_vm2, %v809_v14, -inf  ;;  %v442_v5 = vsel %vm411_vm3, %v819_v19, -inf }
 0x114   :  { %v445_v9 = vsel %vm411_vm3, %v817_v18, -inf }
 0x116   :  { %376 = vmax.xlane.f32.xlu0 %v375_v36  ;;  %v262_v3 = vpop.permute.xlu0 %261 }
 0x117   :  { %v1104_v4 = vmax.f32 %v239_v49, %v262_v3 }
 0x118   :  { %379 = vmax.xlane.f32.xlu2 %v378_v59  ;;  %v448_v59 = vsel %vm411_vm3, %v833_v26, -inf }
 0x11a   :  { %v276_v28 = vpop.permute.xlu2 %275  ;;  %v266_v29 = vpop.permute.xlu1 %265  ;;  %382 = vmax.xlane.f32.xlu1 %v381_v44  ;;  %v451_v44 = vsel %vm411_vm3, %v831_v25, -inf }
 0x11b   :  { %v1108_v33 = vmax.f32 %v246_v56, %v276_v28  ;;  %v1113_v39 = vmax.f32 %v241_v37, %v266_v29  ;;  %v390_v56 = vsel %vm362_vm2, %v821_v20, -inf  ;;  %v393_v37 = vsel %vm362_vm2, %v819_v19, -inf }
 0x11c   :  { %v454_v28 = vsel %vm411_vm3, %v829_v24, -inf }
 0x11e   :  { %385 = vmax.xlane.f32.xlu0 %v384_v15  ;;  %v268_v47 = vpop.permute.xlu0 %267 }
 0x11f   :  { %v1122_v49 = vmax.f32 %v242_v42, %v268_v47  ;;  %v399_v42 = vsel %vm362_vm2, %v833_v26, -inf }
 0x120   :  { %388 = vmax.xlane.f32.xlu2 %v387_v34  ;;  %v457_v34 = vsel %vm411_vm3, %v841_v30, -inf }
 0x122   :  { %v272_v45 = vpop.permute.xlu1 %271  ;;  %391 = vmax.xlane.f32.xlu1 %v390_v56  ;;  %v461_v56 = vsel %vm460_vm4, %v785_v2, -inf }
 0x123   :  { %v1129_v60 = vmax.f32 %v244_v40, %v272_v45  ;;  %v402_v40 = vsel %vm362_vm2, %v831_v25, -inf  ;;  %v464_v45 = vsel %vm460_vm4, %v797_v8, -inf }
 0x126   :  { %394 = vmax.xlane.f32.xlu0 %v393_v37  ;;  %v274_v48 = vpop.permute.xlu0 %273 }
 0x127   :  { %v1138_v57 = vmax.f32 %v245_v55, %v274_v48  ;;  %v408_v55 = vsel %vm362_vm2, %v841_v30, -inf  ;;  %v467_v48 = vsel %vm460_vm4, %v783_v1, -inf }
 0x128   :  { %397 = vmax.xlane.f32.xlu2 %v396_v50 }
 0x12a   :  { %v278_v54 = vpop.permute.xlu1 %277  ;;  %400 = vmax.xlane.f32.xlu1 %v399_v42 }
 0x12b   :  { %v1145_v43 = vmax.f32 %v247_v16, %v278_v54  ;;  %v418_v16 = vsel %vm411_vm3, %v783_v1, -inf  ;;  %v470_v54 = vsel %vm460_vm4, %v795_v7, -inf }
 0x12e   :  { %403 = vmax.xlane.f32.xlu0 %v402_v40  ;;  %v280_v51 = vpop.permute.xlu0 %279  ;;  %v473_v40 = vsel %vm460_vm4, %v781_v0, -inf }
 0x12f   :  { %v1151_v52 = vmax.f32 %v248_v22, %v280_v51  ;;  %v421_v22 = vsel %vm411_vm3, %v795_v7, -inf }
 0x130   :  { %406 = vmax.xlane.f32.xlu2 %v405_v21 }
 0x132   :  { %409 = vmax.xlane.f32.xlu1 %v408_v55  ;;  %v476_v55 = vsel %vm460_vm4, %v793_v6, -inf }
 0x136   :  { %413 = vmax.xlane.f32.xlu0 %v412_v23 }
 0x138   :  { %416 = vmax.xlane.f32.xlu2 %v415_v10  ;;  %v479_v10 = vsel %vm460_vm4, %v809_v14, -inf }
 0x13a   :  { %419 = vmax.xlane.f32.xlu1 %v418_v16  ;;  %v482_v16 = vsel %vm460_vm4, %v807_v13, -inf }
 0x13e   :  { %422 = vmax.xlane.f32.xlu0 %v421_v22 }
 0x140   :  { %425 = vmax.xlane.f32.xlu2 %v424_v46 }
 0x142   :  { %428 = vmax.xlane.f32.xlu1 %v427_v62  ;;  %v485_v62 = vsel %vm460_vm4, %v805_v12, -inf }
 0x146   :  { %431 = vmax.xlane.f32.xlu0 %v430_v17 }
 0x148   :  { %434 = vmax.xlane.f32.xlu2 %v433_v27  ;;  %v488_v27 = vsel %vm460_vm4, %v821_v20, -inf }
 0x14a   :  { %437 = vmax.xlane.f32.xlu1 %v436_v31  ;;  %v491_v31 = vsel %vm460_vm4, %v819_v19, -inf }
 0x14e   :  { %440 = vmax.xlane.f32.xlu0 %v439_v38 }
 0x150   :  { %443 = vmax.xlane.f32.xlu2 %v442_v5 }
 0x152   :  { %446 = vmax.xlane.f32.xlu1 %v445_v9  ;;  %v494_v9 = vsel %vm460_vm4, %v817_v18, -inf }
 0x153   :  { %v1179_v36 = vpop.xlane.xlu2 %315 }
 0x155   :  { %v1183_v3 = vpop.xlane.xlu1 %318 }
 0x156   :  { %449 = vmax.xlane.f32.xlu0 %v448_v59 }
 0x158   :  { %452 = vmax.xlane.f32.xlu2 %v451_v44  ;;  %v497_v44 = vsel %vm460_vm4, %v833_v26, -inf }
 0x159   :  { %v1189_v29 = vpop.xlane.xlu0 %321 }
 0x15a   :  { %455 = vmax.xlane.f32.xlu1 %v454_v28  ;;  %v500_v28 = vsel %vm460_vm4, %v831_v25, -inf }
 0x15b   :  { %v1191_v15 = vpop.xlane.xlu2 %324 }
 0x15d   :  { %v1195_v47 = vpop.xlane.xlu1 %327 }
 0x15e   :  { %458 = vmax.xlane.f32.xlu0 %v457_v34 }
 0x160   :  { %462 = vmax.xlane.f32.xlu2 %v461_v56 }
 0x161   :  { %v1201_v37 = vpop.xlane.xlu0 %330 }
 0x162   :  { %465 = vmax.xlane.f32.xlu1 %v464_v45  ;;  %v503_v45 = vsel %vm460_vm4, %v829_v24, -inf }
 0x163   :  { %v1203_v50 = vpop.xlane.xlu2 %333 }
 0x165   :  { %v1207_v42 = vpop.xlane.xlu1 %336 }
 0x166   :  { %468 = vmax.xlane.f32.xlu0 %v467_v48 }
 0x168   :  { %471 = vmax.xlane.f32.xlu2 %v470_v54  ;;  %v506_v54 = vsel %vm460_vm4, %v841_v30, -inf }
 0x169   :  { %v1213_v21 = vpop.xlane.xlu0 %339 }
 0x16a   :  { %474 = vmax.xlane.f32.xlu1 %v473_v40  ;;  %v510_v40 = vsel %vm509_vm5, %v785_v2, -inf }
 0x16b   :  { %v1215_v51 = vpop.xlane.xlu2 %342 }
 0x16d   :  { %v1219_v23 = vpop.xlane.xlu1 %345 }
 0x16e   :  { %477 = vmax.xlane.f32.xlu0 %v476_v55 }
 0x170   :  { %480 = vmax.xlane.f32.xlu2 %v479_v10 }
 0x171   :  { %v1225_v22 = vpop.xlane.xlu0 %348 }
 0x172   :  { %1645 = vst [vmem:[#allocation5_spill] sm:$0xff] %v1225_v22  ;;  %483 = vmax.xlane.f32.xlu1 %v482_v16  ;;  %v513_v16 = vsel %vm509_vm5, %v797_v8, -inf  ;;  %v525_v8 = vsel %vm509_vm5, %v793_v6, -inf  ;;  %v537_v6 = vsel %vm509_vm5, %v821_v20, -inf }
 0x173   :  { %v1227_v46 = vpop.xlane.xlu2 %351 }
 0x174   :  { %1646 = vst [vmem:[#allocation6_spill] sm:$0xff] %v1227_v46 }
 0x175   :  { %v1231_v17 = vpop.xlane.xlu1 %354 }
 0x176   :  { %486 = vmax.xlane.f32.xlu0 %v485_v62 }
 0x178   :  { %489 = vmax.xlane.f32.xlu2 %v488_v27  ;;  %v516_v27 = vsel %vm509_vm5, %v783_v1, -inf  ;;  %v528_v1 = vsel %vm509_vm5, %v809_v14, -inf }
 0x179   :  { %v1237_v38 = vpop.xlane.xlu0 %357 }
 0x17a   :  { %1647 = vst [vmem:[#allocation7_spill] sm:$0xff] %v1237_v38  ;;  %492 = vmax.xlane.f32.xlu1 %v491_v31  ;;  %v519_v31 = vsel %vm509_vm5, %v795_v7, -inf }
 0x17b   :  { %v1239_v5 = vpop.xlane.xlu2 %360 }
 0x17c   :  { %1648 = vst [vmem:[#allocation8_spill] sm:$0xff] %v1239_v5 }
 0x17d   :  { %v1243_v59 = vpop.xlane.xlu1 %364 }
 0x17e   :  { %495 = vmax.xlane.f32.xlu0 %v494_v9 }
 0x180   :  { %498 = vmax.xlane.f32.xlu2 %v497_v44  ;;  %v522_v44 = vsel %vm509_vm5, %v781_v0, -inf  ;;  %v534_v0 = vsel %vm509_vm5, %v805_v12, -inf  ;;  %v546_v12 = vsel %vm509_vm5, %v833_v26, -inf }
 0x181   :  { %v1249_v34 = vpop.xlane.xlu0 %367 }
 0x182   :  { %501 = vmax.xlane.f32.xlu1 %v500_v28 }
 0x183   :  { %v1251_v56 = vpop.xlane.xlu2 %370 }
 0x185   :  { %v1255_v48 = vpop.xlane.xlu1 %373 }
 0x186   :  { %504 = vmax.xlane.f32.xlu0 %v503_v45 }
 0x188   :  { %507 = vmax.xlane.f32.xlu2 %v506_v54  ;;  %v531_v54 = vsel %vm509_vm5, %v807_v13, -inf  ;;  %v543_v13 = vsel %vm509_vm5, %v817_v18, -inf  ;;  %v555_v18 = vsel %vm509_vm5, %v841_v30, -inf }
 0x189   :  { %v1261_v55 = vpop.xlane.xlu0 %376 }
 0x18a   :  { %511 = vmax.xlane.f32.xlu1 %v510_v40 }
 0x18b   :  { %v1263_v10 = vpop.xlane.xlu2 %379 }
 0x18d   :  { %v1267_v62 = vpop.xlane.xlu1 %382 }
 0x18e   :  { %514 = vmax.xlane.f32.xlu0 %v513_v16 }
 0x190   :  { %517 = vmax.xlane.f32.xlu2 %v516_v27  ;;  %v540_v27 = vsel %vm509_vm5, %v819_v19, -inf  ;;  %v552_v19 = vsel %vm509_vm5, %v829_v24, -inf }
 0x191   :  { %v1273_v2 = vpop.xlane.xlu0 %385 }
 0x192   :  { %520 = vmax.xlane.f32.xlu1 %v519_v31 }
 0x193   :  { %v1275_v9 = vpop.xlane.xlu2 %388 }
 0x195   :  { %v1279_v28 = vpop.xlane.xlu1 %391 }
 0x196   :  { %523 = vmax.xlane.f32.xlu0 %v522_v44 }
 0x198   :  { %526 = vmax.xlane.f32.xlu2 %v525_v8  ;;  %v549_v8 = vsel %vm509_vm5, %v831_v25, -inf }
 0x199   :  { %v1285_v7 = vpop.xlane.xlu0 %394 }
 0x19a   :  { %529 = vmax.xlane.f32.xlu1 %v528_v1 }
 0x19b   :  { %v1287_v45 = vpop.xlane.xlu2 %397 }
 0x19c   :  { %1649 = vst [vmem:[#allocation9_spill] sm:$0xff] %v1287_v45 }
 0x19d   :  { %v1291_v40 = vpop.xlane.xlu1 %400 }
 0x19e   :  { %1650 = vst [vmem:[#allocation10_spill] sm:$0xff] %v1291_v40  ;;  %532 = vmax.xlane.f32.xlu0 %v531_v54 }
 0x1a0   :  { %535 = vmax.xlane.f32.xlu2 %v534_v0 }
 0x1a1   :  { %v1297_v14 = vpop.xlane.xlu0 %403 }
 0x1a2   :  { %538 = vmax.xlane.f32.xlu1 %v537_v6 }
 0x1a3   :  { %v1299_v16 = vpop.xlane.xlu2 %406 }
 0x1a4   :  { %1651 = vst [vmem:[#allocation11_spill] sm:$0xff] %v1299_v16 }
 0x1a5   :  { %v1303_v31 = vpop.xlane.xlu1 %409 }
 0x1a6   :  { %1652 = vst [vmem:[#allocation12_spill] sm:$0xff] %v1303_v31  ;;  %541 = vmax.xlane.f32.xlu0 %v540_v27 }
 0x1a8   :  { %544 = vmax.xlane.f32.xlu2 %v543_v13 }
 0x1a9   :  { %v1309_v20 = vpop.xlane.xlu0 %413 }
 0x1aa   :  { %547 = vmax.xlane.f32.xlu1 %v546_v12 }
 0x1ab   :  { %v1311_v44 = vpop.xlane.xlu2 %416 }
 0x1ad   :  { %v1315_v1 = vpop.xlane.xlu1 %419 }
 0x1ae   :  { %550 = vmax.xlane.f32.xlu0 %v549_v8 }
 0x1b0   :  { %553 = vmax.xlane.f32.xlu2 %v552_v19 }
 0x1b1   :  { %v1321_v26 = vpop.xlane.xlu0 %422 }
 0x1b2   :  { %556 = vmax.xlane.f32.xlu1 %v555_v18 }
 0x1b3   :  { %v1323_v54 = vpop.xlane.xlu2 %425 }
 0x1b5   :  { %v1325_v0 = vpop.xlane.xlu1 %428 }
 0x1b9   :  { %v1327_v6 = vpop.xlane.xlu0 %431 }
 0x1bb   :  { %v1329_v25 = vpop.xlane.xlu2 %434 }
 0x1bd   :  { %v1331_v27 = vpop.xlane.xlu1 %437 }
 0x1c1   :  { %v1333_v13 = vpop.xlane.xlu0 %440 }
 0x1c2   :  { %1653 = vst [vmem:[#allocation13_spill] sm:$0xff] %v1333_v13  ;;  %574 = vrot.lane.b32.xlu0 %v1068_v63, %s767_s15 }
 0x1c3   :  { %v1337_v24 = vpop.xlane.xlu2 %443 }
 0x1c5   :  { %v1339_v30 = vpop.xlane.xlu1 %446 }
 0x1c6   :  { %1654 = vst [vmem:[#allocation14_spill] sm:$0xff] %v1339_v30 }
 0x1c8   :  { %576 = vrot.lane.b32.xlu2 %v1044_v61, %s767_s15 }
 0x1c9   :  { %v1343_v12 = vpop.xlane.xlu0 %449 }
 0x1ca   :  { %1655 = vst [vmem:[#allocation15_spill] sm:$0xff] %v1343_v12  ;;  %580 = vrot.lane.b32.xlu0 %v1086_v35, %s767_s15 }
 0x1cb   :  { %v1347_v8 = vpop.xlane.xlu2 %452  ;;  %578 = vrot.lane.b32.xlu1 %v1077_v58, %s767_s15 }
 0x1cd   :  { %v1351_v19 = vpop.xlane.xlu1 %455 }
 0x1ce   :  { %1656 = vst [vmem:[#allocation16_spill] sm:$0xff] %v1351_v19 }
 0x1d0   :  { %582 = vrot.lane.b32.xlu2 %v1057_v32, %s767_s15 }
 0x1d1   :  { %v1355_v63 = vpop.xlane.xlu0 %458 }
 0x1d2   :  { %1657 = vst [vmem:[#allocation17_spill] sm:$0xff] %v1355_v63  ;;  %584 = vrot.lane.b32.xlu0 %v1095_v53, %s767_s15 }
 0x1d3   :  { %v1359_v61 = vpop.xlane.xlu2 %462  ;;  %586 = vrot.lane.b32.xlu1 %v1104_v4, %s767_s15 }
 0x1d5   :  { %v466_v35 = vpop.xlane.xlu1 %465 }
 0x1d8   :  { %588 = vrot.lane.b32.xlu2 %v1072_v41, %s767_s15 }
 0x1d9   :  { %v1365_v58 = vpop.xlane.xlu0 %468 }
 0x1da   :  { %590 = vrot.lane.b32.xlu0 %v1113_v39, %s767_s15 }
 0x1db   :  { %v1369_v32 = vpop.xlane.xlu2 %471  ;;  %592 = vrot.lane.b32.xlu1 %v1122_v49, %s767_s15 }
 0x1dd   :  { %v475_v53 = vpop.xlane.xlu1 %474 }
 0x1e0   :  { %594 = vrot.lane.b32.xlu2 %v1090_v11, %s767_s15 }
 0x1e1   :  { %v1375_v18 = vpop.xlane.xlu0 %477 }
 0x1e2   :  { %596 = vrot.lane.b32.xlu0 %v1129_v60, %s767_s15 }
 0x1e3   :  { %v1379_v41 = vpop.xlane.xlu2 %480  ;;  %598 = vrot.lane.b32.xlu1 %v1138_v57, %s767_s15 }
 0x1e5   :  { %v1383_v4 = vpop.xlane.xlu1 %483 }
 0x1e8   :  { %600 = vrot.lane.b32.xlu2 %v1108_v33, %s767_s15 }
 0x1e9   :  { %v1387_v39 = vpop.xlane.xlu0 %486 }
 0x1ea   :  { %602 = vrot.lane.b32.xlu0 %v1145_v43, %s767_s15 }
 0x1eb   :  { %v1391_v11 = vpop.xlane.xlu2 %489  ;;  %604 = vrot.lane.b32.xlu1 %v1151_v52, %s767_s15 }
 0x1ec   :  { %1658 = vst [vmem:[#allocation18_spill] sm:$0xff] %v1391_v11 }
 0x1ed   :  { %v1395_v49 = vpop.xlane.xlu1 %492 }
 0x1f1   :  { %v1397_v60 = vpop.xlane.xlu0 %495 }
 0x1f2   :  { %1659 = vst [vmem:[#allocation19_spill] sm:$0xff] %v1397_v60 }
 0x1f3   :  { %v1399_v57 = vpop.xlane.xlu2 %498 }
 0x1f4   :  { %1660 = vst [vmem:[#allocation20_spill] sm:$0xff] %v1399_v57 }
 0x1f5   :  { %v1401_v63 = vpop.xlane.xlu1 %501 }
 0x1f9   :  { %v1403_v31 = vpop.xlane.xlu0 %504 }
 0x1fa   :  { %1661 = vst [vmem:[#allocation21_spill] sm:$0xff] %v1403_v31 }
 0x1fb   :  { %v1405_v33 = vpop.xlane.xlu2 %507 }
 0x1fc   :  { %1662 = vst [vmem:[#allocation22_spill] sm:$0xff] %v1405_v33 }
 0x1fd   :  { %v512_v19 = vpop.xlane.xlu1 %511 }
 0x201   :  { %v515_v43 = vpop.xlane.xlu0 %514 }
 0x203   :  { %v518_v5 = vpop.xlane.xlu2 %517 }
 0x205   :  { %v521_v38 = vpop.xlane.xlu1 %520 }
 0x209   :  { %v524_v12 = vpop.xlane.xlu0 %523 }
 0x20b   :  { %v1407_v16 = vpop.xlane.xlu2 %526 }
 0x20d   :  { %v1411_v40 = vpop.xlane.xlu1 %529 }
 0x211   :  { %v533_v60 = vpop.xlane.xlu0 %532 }
 0x213   :  { %v1409_v52 = vpop.xlane.xlu2 %535 }
 0x214   :  { %1663 = vst [vmem:[#allocation23_spill] sm:$0xff] %v1409_v52 }
 0x215   :  { %v1415_v57 = vpop.xlane.xlu1 %538 }
 0x216   :  { %1665 = vst [vmem:[#allocation25_spill] sm:$0xff] %v1415_v57 }
 0x219   :  { %v1417_v46 = vpop.xlane.xlu0 %541 }
 0x21b   :  { %v1413_v30 = vpop.xlane.xlu2 %544 }
 0x21c   :  { %1664 = vst [vmem:[#allocation24_spill] sm:$0xff] %v1413_v30 }
 0x21d   :  { %v1421_v33 = vpop.xlane.xlu1 %547 }
 0x21e   :  { %1667 = vst [vmem:[#allocation27_spill] sm:$0xff] %v1421_v33 }
 0x221   :  { %v1423_v22 = vpop.xlane.xlu0 %550 }
 0x223   :  { %v1419_v31 = vpop.xlane.xlu2 %553 }
 0x224   :  { %1666 = vst [vmem:[#allocation26_spill] sm:$0xff] %v1419_v31 }
 0x225   :  { %v1439_v13 = vpop.xlane.xlu1 %556 }
 0x22b   :  { %v577_v45 = vpop.permute.xlu2 %576 }
 0x22c   :  { %v624_v11 = vsel %vm622_vm6, %v577_v45, %v1183_v3 }
 0x22d   :  { %v640_v30 = vsel %vm40_vm0, %v624_v11, %v1249_v34 }
 0x22e   :  { %v657_v57 = vsel %vm655_vm7, %v640_v30, %v1311_v44 }
 0x22f   :  { %v674_v31 = vsel %vm672_vm8, %v657_v57, %v466_v35 }
 0x230   :  { %v691_v33 = vsel %vm689_vm9, %v674_v31, %v515_v43 }
 0x231   :  { %708 = vst.msk [vmem:[%s1644_s1 + $0x8] sm:$0xff] %vm706_vm10, %v691_v33 }
 0x233   :  { %v583_v52 = vpop.permute.xlu2 %582 }
 0x234   :  { %v627_v3 = vsel %vm622_vm6, %v583_v52, %v1195_v47  ;;  %v575_v45 = vpop.permute.xlu0 %574 }
 0x235   :  { %v643_v34 = vsel %vm40_vm0, %v627_v3, %v1261_v55  ;;  %v623_v44 = vsel %vm622_vm6, %v575_v45, %v1179_v36 }
 0x236   :  { %v660_v31 = vsel %vm655_vm7, %v643_v34, %v1323_v54  ;;  %v639_v30 = vsel %vm40_vm0, %v623_v44, %v1243_v59 }
 0x237   :  { %v677_v35 = vsel %vm672_vm8, %v660_v31, %v475_v53  ;;  %v656_v47 = vsel %vm655_vm7, %v639_v30, %v1309_v20  ;;  %v1668_v30 = vld [vmem:[#allocation13_spill] sm:$0xff] }
 0x238   :  { %v694_v11 = vsel %vm689_vm9, %v677_v35, %v524_v12  ;;  %v673_v57 = vsel %vm672_vm8, %v656_v47, %v1359_v61  ;;  %v1672_v47 = vld [vmem:[#allocation5_spill] sm:$0xff] }
 0x239   :  { %711 = vst.msk [vmem:[%s1644_s1 + $0x20] sm:$0xff] %vm706_vm10, %v694_v11  ;;  %v690_v36 = vsel %vm689_vm9, %v673_v57, %v512_v19 }
 0x23a   :  { %707 = vst.msk [vmem:[%s1644_s1] sm:$0xff] %vm706_vm10, %v690_v36  ;;  %v1673_v36 = vld [vmem:[#allocation9_spill] sm:$0xff] }
 0x23b   :  { %v589_v59 = vpop.permute.xlu2 %588 }
 0x23c   :  { %v630_v55 = vsel %vm622_vm6, %v589_v59, %v1207_v42  ;;  %v581_v20 = vpop.permute.xlu0 %580 }
 0x23d   :  { %v646_v54 = vsel %vm40_vm0, %v630_v55, %v1273_v2  ;;  %v626_v12 = vsel %vm622_vm6, %v581_v20, %v1191_v15  ;;  %v579_v61 = vpop.permute.xlu1 %578  ;;  %v1674_v55 = vld [vmem:[#allocation6_spill] sm:$0xff] }
 0x23e   :  { %v663_v19 = vsel %vm655_vm7, %v646_v54, %v1329_v25  ;;  %v642_v53 = vsel %vm40_vm0, %v626_v12, %v1255_v48  ;;  %v625_v33 = vsel %vm622_vm6, %v579_v61, %v1189_v29  ;;  %v1675_v54 = vld [vmem:[#allocation14_spill] sm:$0xff] }
 0x23f   :  { %v680_v42 = vsel %vm672_vm8, %v663_v19, %v1383_v4  ;;  %v659_v43 = vsel %vm655_vm7, %v642_v53, %v1321_v26  ;;  %v641_v2 = vsel %vm40_vm0, %v625_v33, %v1251_v56  ;;  %v1676_v61 = vld [vmem:[#allocation10_spill] sm:$0xff]  ;;  %v1677_v53 = vld [vmem:[#allocation19_spill] sm:$0xff] }
 0x240   :  { %v697_v15 = vsel %vm689_vm9, %v680_v42, %v533_v60  ;;  %v676_v25 = vsel %vm672_vm8, %v659_v43, %v1369_v32  ;;  %v658_v48 = vsel %vm655_vm7, %v641_v2, %v1315_v1  ;;  %v1678_v42 = vld [vmem:[#allocation15_spill] sm:$0xff]  ;;  %v1679_v2 = vld [vmem:[#allocation24_spill] sm:$0xff] }
 0x241   :  { %714 = vst.msk [vmem:[%s1644_s1 + $0x38] sm:$0xff] %vm706_vm10, %v697_v15  ;;  %v693_v29 = vsel %vm689_vm9, %v676_v25, %v521_v38  ;;  %v675_v26 = vsel %vm672_vm8, %v658_v48, %v1365_v58  ;;  %v1680_v25 = vld [vmem:[#allocation20_spill] sm:$0xff] }
 0x242   :  { %710 = vst.msk [vmem:[%s1644_s1 + $0x18] sm:$0xff] %vm706_vm10, %v693_v29  ;;  %v692_v56 = vsel %vm689_vm9, %v675_v26, %v518_v5  ;;  %v1681_v29 = vld [vmem:[#allocation27_spill] sm:$0xff] }
 0x243   :  { %709 = vst.msk [vmem:[%s1644_s1 + $0x10] sm:$0xff] %vm706_vm10, %v692_v56  ;;  %v595_v1 = vpop.permute.xlu2 %594 }
 0x244   :  { %v633_v32 = vsel %vm622_vm6, %v595_v1, %v1219_v23  ;;  %v585_v38 = vpop.permute.xlu0 %584  ;;  %v1682_v1 = vld [vmem:[#allocation7_spill] sm:$0xff] }
 0x245   :  { %v649_v58 = vsel %vm40_vm0, %v633_v32, %v1285_v7  ;;  %v628_v4 = vsel %vm622_vm6, %v585_v38, %v1201_v37  ;;  %v587_v60 = vpop.permute.xlu1 %586 }
 0x246   :  { %v666_v5 = vsel %vm655_vm7, %v649_v58, %v1337_v24  ;;  %v644_v52 = vsel %vm40_vm0, %v628_v4, %v1263_v10  ;;  %v629_v3 = vsel %vm622_vm6, %v587_v60, %v1203_v50  ;;  %v1683_v58 = vld [vmem:[#allocation11_spill] sm:$0xff]  ;;  %v1684_v60 = vld [vmem:[#allocation8_spill] sm:$0xff] }
 0x247   :  { %v683_v23 = vsel %vm672_vm8, %v666_v5, %v1395_v49  ;;  %v661_v45 = vsel %vm655_vm7, %v644_v52, %v1325_v0  ;;  %v645_v7 = vsel %vm40_vm0, %v629_v3, %v1267_v62  ;;  %v1685_v52 = vld [vmem:[#allocation16_spill] sm:$0xff] }
 0x248   :  { %v700_v37 = vsel %vm689_vm9, %v683_v23, %v1417_v46  ;;  %v678_v24 = vsel %vm672_vm8, %v661_v45, %v1375_v18  ;;  %v662_v10 = vsel %vm655_vm7, %v645_v7, %v1327_v6  ;;  %v1686_v23 = vld [vmem:[#allocation12_spill] sm:$0xff]  ;;  %v1687_v7 = vld [vmem:[#allocation21_spill] sm:$0xff] }
 0x249   :  { %717 = vst.msk [vmem:[%s1644_s1 + $0x50] sm:$0xff] %vm706_vm10, %v700_v37  ;;  %v695_v50 = vsel %vm689_vm9, %v678_v24, %v1407_v16  ;;  %v679_v62 = vsel %vm672_vm8, %v662_v10, %v1379_v41  ;;  %v1688_v24 = vld [vmem:[#allocation17_spill] sm:$0xff] }
 0x24a   :  { %712 = vst.msk [vmem:[%s1644_s1 + $0x28] sm:$0xff] %vm706_vm10, %v695_v50  ;;  %v696_v46 = vsel %vm689_vm9, %v679_v62, %v1411_v40  ;;  %v1689_v50 = vld [vmem:[#allocation26_spill] sm:$0xff] }
 0x24b   :  { %713 = vst.msk [vmem:[%s1644_s1 + $0x30] sm:$0xff] %vm706_vm10, %v696_v46  ;;  %v601_v0 = vpop.permute.xlu2 %600  ;;  %v1690_v46 = vld [vmem:[#allocation22_spill] sm:$0xff] }
 0x24c   :  { %v636_v16 = vsel %vm622_vm6, %v601_v0, %v1231_v17  ;;  %v591_v6 = vpop.permute.xlu0 %590 }
 0x24d   :  { %v652_v18 = vsel %vm40_vm0, %v636_v16, %v1297_v14  ;;  %v631_v41 = vsel %vm622_vm6, %v591_v6, %v1213_v21  ;;  %v593_v49 = vpop.permute.xlu1 %592 }
 0x24e   :  { %v669_v40 = vsel %vm655_vm7, %v652_v18, %v1347_v8  ;;  %v647_v34 = vsel %vm40_vm0, %v631_v41, %v1275_v9  ;;  %v632_v44 = vsel %vm622_vm6, %v593_v49, %v1215_v51  ;;  %v1669_v51 = vld [vmem:[#allocation23_spill] sm:$0xff] }
 0x24f   :  { %v686_v17 = vsel %vm672_vm8, %v669_v40, %v1401_v63  ;;  %v664_v31 = vsel %vm655_vm7, %v647_v34, %v1331_v27  ;;  %v648_v14 = vsel %vm40_vm0, %v632_v44, %v1279_v28  ;;  %v1670_v63 = vld [vmem:[#allocation18_spill] sm:$0xff] }
 0x250   :  { %v703_v21 = vsel %vm689_vm9, %v686_v17, %v1423_v22  ;;  %v681_v8 = vsel %vm672_vm8, %v664_v31, %v1387_v39  ;;  %v665_v9 = vsel %vm655_vm7, %v648_v14, %v1668_v30  ;;  %v1671_v22 = vld [vmem:[#allocation25_spill] sm:$0xff] }
 0x251   :  { %720 = vst.msk [vmem:[%s1644_s1 + $0x68] sm:$0xff] %vm706_vm10, %v703_v21  ;;  %v698_v27 = vsel %vm689_vm9, %v681_v8, %v1669_v51  ;;  %v682_v28 = vsel %vm672_vm8, %v665_v9, %v1670_v63 }
 0x252   :  { %715 = vst.msk [vmem:[%s1644_s1 + $0x40] sm:$0xff] %vm706_vm10, %v698_v27  ;;  %v699_v39 = vsel %vm689_vm9, %v682_v28, %v1671_v22 }
 0x253   :  { %716 = vst.msk [vmem:[%s1644_s1 + $0x48] sm:$0xff] %vm706_vm10, %v699_v39 }
 0x254   :  { %v597_v35 = vpop.permute.xlu0 %596 }
 0x255   :  { %v634_v11 = vsel %vm622_vm6, %v597_v35, %v1672_v47  ;;  %v599_v57 = vpop.permute.xlu1 %598 }
 0x256   :  { %v650_v59 = vsel %vm40_vm0, %v634_v11, %v1673_v36  ;;  %v635_v20 = vsel %vm622_vm6, %v599_v57, %v1674_v55 }
 0x257   :  { %v667_v12 = vsel %vm655_vm7, %v650_v59, %v1675_v54  ;;  %v651_v19 = vsel %vm40_vm0, %v635_v20, %v1676_v61 }
 0x258   :  { %v684_v33 = vsel %vm672_vm8, %v667_v12, %v1677_v53  ;;  %v668_v43 = vsel %vm655_vm7, %v651_v19, %v1678_v42 }
 0x259   :  { %v701_v15 = vsel %vm689_vm9, %v684_v33, %v1679_v2  ;;  %v685_v48 = vsel %vm672_vm8, %v668_v43, %v1680_v25 }
 0x25a   :  { %718 = vst.msk [vmem:[%s1644_s1 + $0x58] sm:$0xff] %vm706_vm10, %v701_v15  ;;  %v702_v26 = vsel %vm689_vm9, %v685_v48, %v1681_v29 }
 0x25b   :  { %719 = vst.msk [vmem:[%s1644_s1 + $0x60] sm:$0xff] %vm706_vm10, %v702_v26 }
 0x25c   :  { %v603_v56 = vpop.permute.xlu0 %602 }
 0x25d   :  { %v637_v32 = vsel %vm622_vm6, %v603_v56, %v1682_v1  ;;  %v605_v38 = vpop.permute.xlu1 %604 }
 0x25e   :  { %v653_v4 = vsel %vm40_vm0, %v637_v32, %v1683_v58  ;;  %v638_v5 = vsel %vm622_vm6, %v605_v38, %v1684_v60 }
 0x25f   :  { %v670_v3 = vsel %vm655_vm7, %v653_v4, %v1685_v52  ;;  %v654_v45 = vsel %vm40_vm0, %v638_v5, %v1686_v23 }
 0x260   :  { %v687_v37 = vsel %vm672_vm8, %v670_v3, %v1687_v7  ;;  %v671_v10 = vsel %vm655_vm7, %v654_v45, %v1688_v24 }
 0x261   :  { %v704_v62 = vsel %vm689_vm9, %v687_v37, %v1689_v50  ;;  %v688_v0 = vsel %vm672_vm8, %v671_v10, %v1690_v46 }
 0x262   :  { %721 = vst.msk [vmem:[%s1644_s1 + $0x70] sm:$0xff] %vm706_vm10, %v704_v62  ;;  %v705_v16 = vsel %vm689_vm9, %v688_v0, %v1439_v13 }
 0x263   :  { %722 = vst.msk [vmem:[%s1644_s1 + $0x78] sm:$0xff] %vm706_vm10, %v705_v16 }
 0x264   :  { %727 = vsyncpa [#allocation3], 1 }

</bundles_post_ra>
